<compile_context>
chip_gen: v7x
topology: tpu7x:2x2x1
jax: 0.10.0
libtpu: 0.0.40
codegen_flags: <defaults>
</compile_context>

<pallas_src>
import functools

import jax
import jax.numpy as jnp
from jax.experimental import pallas as pl
from jax.experimental.pallas import tpu as pltpu


def mhsa_kernel(x_ref, wqkv_ref, bqkv_ref, w0_ref, b0_ref, o_ref, *,
                n_heads, head_dim, scale):
    # x_ref   : [1, n_seq, Dp]            (one batch element, model dim padded to 128-mult)
    # wqkv_ref: [Dp, 3*n_heads*head_dim]  (grid-invariant -> not re-DMA'd between steps)
    # bqkv_ref: [1, 3*n_heads*head_dim]
    # w0_ref  : [n_heads*head_dim, Dp]
    # b0_ref  : [1, Dp]
    # o_ref   : [1, n_seq, Dp]
    x = x_ref[0]                          # [n_seq, Dp]
    mxu_dt = x.dtype                      # matmul operand dtype (bf16 path supported)
    hd = n_heads * head_dim

    # Fused QKV projection (one big MXU matmul), f32 accumulation + f32 bias epilogue.
    qkv = jnp.dot(x, wqkv_ref[...], preferred_element_type=jnp.float32)
    qkv = qkv + bqkv_ref[...].astype(jnp.float32)            # [n_seq, 3*h*d] f32

    # Per-head attention. n_heads is a small static constant -> unrolled at trace time.
    head_outs = []
    for h in range(n_heads):
        q_h = qkv[:, h * head_dim:(h + 1) * head_dim].astype(mxu_dt)                 # [n, d]
        k_h = qkv[:, hd + h * head_dim: hd + (h + 1) * head_dim].astype(mxu_dt)       # [n, d]
        v_h = qkv[:, 2 * hd + h * head_dim: 2 * hd + (h + 1) * head_dim].astype(mxu_dt)

        # scores = q @ k^T * scale  (contract last dims of both -> no explicit transpose)
        s = jax.lax.dot_general(q_h, k_h, (((1,), (1,)), ((), ())),
                                preferred_element_type=jnp.float32) * scale           # [n, n]
        # numerically-stable softmax over keys, f32 epilogue (no bf16 VPU needed)
        s = s - jnp.max(s, axis=-1, keepdims=True)
        p = jnp.exp(s)
        p = p / jnp.sum(p, axis=-1, keepdims=True)
        head_outs.append(jnp.dot(p.astype(mxu_dt), v_h,
                                 preferred_element_type=jnp.float32))                 # [n, d]

    attn = jnp.concatenate(head_outs, axis=-1)                # [n_seq, h*d] f32

    # Output projection: one large matmul (K = h*d), lane-dense (padded) output.
    out = jnp.dot(attn.astype(mxu_dt), w0_ref[...], preferred_element_type=jnp.float32)
    out = out + b0_ref[...].astype(jnp.float32)               # [n_seq, Dp]
    o_ref[0] = out.astype(o_ref.dtype)


def mhsa_forward(x, w_qkv, b_qkv, w_0, b_0, *, n_heads):
    """x: [b, n_seq, in_dim] -> [b, n_seq, in_dim] (matches MHSA.forward)."""
    b, n_seq, in_dim = x.shape
    head_dim = in_dim                      # module defines qkv_dim = in_dim
    hd = n_heads * head_dim
    qkv_w = 3 * hd
    assert w_qkv.shape == (in_dim, qkv_w)
    assert w_0.shape == (hd, in_dim)

    # --- Lane-dense padding of the model dim (wrapper-side plumbing only). ---
    LANE = 128
    Dp = ((in_dim + LANE - 1) // LANE) * LANE
    pad = Dp - in_dim
    if pad:
        x_p = jnp.pad(x, ((0, 0), (0, 0), (0, pad)))
        wqkv_p = jnp.pad(w_qkv, ((0, pad), (0, 0)))   # extra zero rows: no effect on x @ W
        w0_p = jnp.pad(w_0, ((0, 0), (0, pad)))       # extra zero cols: sliced off below
        b0_p = jnp.pad(b_0, ((0, pad),))
    else:
        x_p, wqkv_p, w0_p, b0_p = x, w_qkv, w_0, b_0
    bqkv_2d = b_qkv.reshape(1, qkv_w)
    b0_2d = b0_p.reshape(1, Dp)

    scale = float(head_dim) ** -0.5
    kernel = functools.partial(mhsa_kernel, n_heads=n_heads, head_dim=head_dim, scale=scale)

    # Advisory cost estimate for XLA scheduling.
    flops = int(2 * b * n_seq * Dp * qkv_w                       # QKV projection
                + 4 * b * n_heads * n_seq * n_seq * head_dim     # QK^T and PV
                + 2 * b * n_seq * hd * Dp)                       # output projection
    transcendentals = int(b * n_heads * n_seq * n_seq)
    itemsize = jnp.dtype(x.dtype).itemsize
    bytes_accessed = int((x_p.size + wqkv_p.size + bqkv_2d.size + w0_p.size + b0_2d.size
                          + b * n_seq * Dp) * itemsize)

    out_p = pl.pallas_call(
        kernel,
        out_shape=jax.ShapeDtypeStruct((b, n_seq, Dp), x.dtype),
        grid_spec=pltpu.PrefetchScalarGridSpec(
            num_scalar_prefetch=0,
            grid=(b,),                                 # >= 2 steps -> both v7x TCs get work
            in_specs=[
                pl.BlockSpec((1, n_seq, Dp), lambda i: (i, 0, 0)),   # x tile (per batch)
                pl.BlockSpec((Dp, qkv_w), lambda i: (0, 0)),          # Wqkv (grid-invariant)
                pl.BlockSpec((1, qkv_w), lambda i: (0, 0)),           # bqkv
                pl.BlockSpec((hd, Dp), lambda i: (0, 0)),             # W0
                pl.BlockSpec((1, Dp), lambda i: (0, 0)),              # b0
            ],
            out_specs=pl.BlockSpec((1, n_seq, Dp), lambda i: (i, 0, 0)),
        ),
        compiler_params=pltpu.CompilerParams(
            dimension_semantics=("parallel",),
            vmem_limit_bytes=32 * 1024 * 1024,         # fits v7x's 64 MiB/TC with headroom
        ),
        cost_estimate=pl.CostEstimate(
            flops=flops, transcendentals=transcendentals, bytes_accessed=bytes_accessed),
    )(x_p, wqkv_p, bqkv_2d, w0_p, b0_2d)

    return out_p[..., :in_dim] if pad else out_p
    # TODO(synk): for long sequences / large models, additionally tile n_seq (q-blocks of
    # 256-512 rows) and stream K/V blocks with an online softmax instead of whole-seq scores.


if __name__ == "__main__":
    # Small shapes consistent with forward(): x is [b_size, n_seq, in_dim], n_heads heads,
    # head_dim == in_dim (per the module definition).
    b_size, n_seq, in_dim, n_heads = 2, 8, 32, 4
    head_dim = in_dim
    hd = n_heads * head_dim            # 128

    key = jax.random.PRNGKey(0)
    kx, k1, k2, k3, k4 = jax.random.split(key, 5)

    x = jax.random.normal(kx, (b_size, n_seq, in_dim), dtype=jnp.float32)
    lim_qkv = 1.0 / (in_dim ** 0.5)
    lim_0 = 1.0 / (hd ** 0.5)
    w_qkv = jax.random.uniform(k1, (in_dim, 3 * hd), jnp.float32, -lim_qkv, lim_qkv)
    b_qkv = jax.random.uniform(k2, (3 * hd,), jnp.float32, -lim_qkv, lim_qkv)
    w_0 = jax.random.uniform(k3, (hd, in_dim), jnp.float32, -lim_0, lim_0)
    b_0 = jax.random.uniform(k4, (in_dim,), jnp.float32, -lim_0, lim_0)

    out = mhsa_forward(x, w_qkv, b_qkv, w_0, b_0, n_heads=n_heads)
    jax.block_until_ready(out)

    # Pure-JAX reference (same math as the PyTorch module, full-precision matmuls).
    with jax.default_matmul_precision("float32"):
        qkv = x @ w_qkv + b_qkv                                     # [b, n, 3*h*d]
        q, k, v = jnp.split(qkv, 3, axis=-1)                        # chunk(3, dim=-1)

        def to_heads(t):  # 'b n (h d) -> b h n d'
            return t.reshape(b_size, n_seq, n_heads, head_dim).transpose(0, 2, 1, 3)

        qh, kh, vh = to_heads(q), to_heads(k), to_heads(v)
        s = jnp.einsum('bhnd,bhtd->bhnt', qh, kh) * (head_dim ** -0.5)
        p = jax.nn.softmax(s, axis=-1)
        av = jnp.einsum('bhnt,bhtd->bhnd', p, vh)
        av = av.transpose(0, 2, 1, 3).reshape(b_size, n_seq, hd)    # 'b h n d -> b n (h d)'
        ref = av @ w_0 + b_0

    assert out.shape == (b_size, n_seq, in_dim)
    assert jnp.allclose(out, ref, atol=1e-3, rtol=1e-3), float(jnp.max(jnp.abs(out - ref)))

    print("KERNEL_OK")
</pallas_src>

<mosaic_0001>
module attributes {stable_mosaic.version = 11 : i64} {
  func.func @mhsa_kernel(%arg0: i32, %arg1: memref<1x8x128xf32, #tpu.memory_space<vmem>>, %arg2: memref<128x384xf32, #tpu.memory_space<vmem>>, %arg3: memref<1x384xf32, #tpu.memory_space<vmem>>, %arg4: memref<128x128xf32, #tpu.memory_space<vmem>>, %arg5: memref<1x128xf32, #tpu.memory_space<vmem>>, %arg6: memref<1x8x128xf32, #tpu.memory_space<vmem>>) attributes {dimension_semantics = [#tpu.dimension_semantics<parallel>], iteration_bounds = array<i64: 2>, scalar_prefetch = 0 : i64, scratch_operands = 0 : i64, tpu.core_type = #tpu.core_type<tc>, window_params = [{transform_indices = @transform_0, window_bounds = array<i64: 1, 8, 128>}, {pipeline_mode = #tpu.pipeline_mode<synchronous>, transform_indices = @transform_1, window_bounds = array<i64: 128, 384>}, {pipeline_mode = #tpu.pipeline_mode<synchronous>, transform_indices = @transform_2, window_bounds = array<i64: 1, 384>}, {pipeline_mode = #tpu.pipeline_mode<synchronous>, transform_indices = @transform_3, window_bounds = array<i64: 128, 128>}, {pipeline_mode = #tpu.pipeline_mode<synchronous>, transform_indices = @transform_4, window_bounds = array<i64: 1, 128>}, {transform_indices = @transform_5, window_bounds = array<i64: 1, 8, 128>}]} {
    %c0 = arith.constant 0 : index
    %c0_0 = arith.constant 0 : index
    %c0_1 = arith.constant 0 : index
    %0 = vector.load %arg1[%c0, %c0_0, %c0_1] : memref<1x8x128xf32, #tpu.memory_space<vmem>>, vector<1x8x128xf32>
    %1 = vector.shape_cast %0 : vector<1x8x128xf32> to vector<8x128xf32>
    %c0_2 = arith.constant 0 : index
    %c0_3 = arith.constant 0 : index
    %2 = vector.load %arg2[%c0_2, %c0_3] : memref<128x384xf32, #tpu.memory_space<vmem>>, vector<128x384xf32>
    %cst = arith.constant dense<0.000000e+00> : vector<8x384xf32>
    %3 = tpu.matmul %1, %2, %cst {dimension_numbers = #tpu.dot_dimension_numbers<[1], [0], [0], [1], [0, 0, 1, 1], [], []>} : vector<8x128xf32>, vector<128x384xf32>, vector<8x384xf32> -> vector<8x384xf32>
    %c0_4 = arith.constant 0 : index
    %c0_5 = arith.constant 0 : index
    %4 = vector.load %arg3[%c0_4, %c0_5] : memref<1x384xf32, #tpu.memory_space<vmem>>, vector<1x384xf32>
    %5 = vector.broadcast %4 : vector<1x384xf32> to vector<8x384xf32>
    %6 = arith.addf %3, %5 : vector<8x384xf32>
    %7 = vector.extract_strided_slice %6 {offsets = [0, 0], sizes = [8, 32], strides = [1, 1]} : vector<8x384xf32> to vector<8x32xf32>
    %8 = vector.extract_strided_slice %6 {offsets = [0, 128], sizes = [8, 32], strides = [1, 1]} : vector<8x384xf32> to vector<8x32xf32>
    %9 = vector.extract_strided_slice %6 {offsets = [0, 256], sizes = [8, 32], strides = [1, 1]} : vector<8x384xf32> to vector<8x32xf32>
    %cst_6 = arith.constant dense<0.000000e+00> : vector<8x8xf32>
    %10 = tpu.matmul %7, %8, %cst_6 {dimension_numbers = #tpu.dot_dimension_numbers<[1], [1], [0], [0], [0, 0, 1, 0], [], []>} : vector<8x32xf32>, vector<8x32xf32>, vector<8x8xf32> -> vector<8x8xf32>
    %cst_7 = arith.constant 0.176776692 : f32
    %11 = vector.broadcast %cst_7 : f32 to vector<8x8xf32>
    %12 = arith.mulf %10, %11 : vector<8x8xf32>
    %cst_8 = arith.constant dense<0xFF800000> : vector<8xf32>
    %13 = vector.multi_reduction <maximumf>, %12, %cst_8 [1] : vector<8x8xf32> to vector<8xf32>
    %14 = vector.shape_cast %13 : vector<8xf32> to vector<8x1xf32>
    %15 = vector.broadcast %14 : vector<8x1xf32> to vector<8x8xf32>
    %16 = arith.subf %12, %15 : vector<8x8xf32>
    %17 = math.exp %16 : vector<8x8xf32>
    %cst_9 = arith.constant dense<0.000000e+00> : vector<8xf32>
    %18 = vector.multi_reduction <add>, %17, %cst_9 [1] : vector<8x8xf32> to vector<8xf32>
    %19 = vector.shape_cast %18 : vector<8xf32> to vector<8x1xf32>
    %20 = vector.broadcast %19 : vector<8x1xf32> to vector<8x8xf32>
    %21 = arith.divf %17, %20 : vector<8x8xf32>
    %cst_10 = arith.constant dense<0.000000e+00> : vector<8x32xf32>
    %22 = tpu.matmul %21, %9, %cst_10 {dimension_numbers = #tpu.dot_dimension_numbers<[1], [0], [0], [1], [0, 0, 1, 1], [], []>} : vector<8x8xf32>, vector<8x32xf32>, vector<8x32xf32> -> vector<8x32xf32>
    %23 = vector.extract_strided_slice %6 {offsets = [0, 32], sizes = [8, 32], strides = [1, 1]} : vector<8x384xf32> to vector<8x32xf32>
    %24 = vector.extract_strided_slice %6 {offsets = [0, 160], sizes = [8, 32], strides = [1, 1]} : vector<8x384xf32> to vector<8x32xf32>
    %25 = vector.extract_strided_slice %6 {offsets = [0, 288], sizes = [8, 32], strides = [1, 1]} : vector<8x384xf32> to vector<8x32xf32>
    %cst_11 = arith.constant dense<0.000000e+00> : vector<8x8xf32>
    %26 = tpu.matmul %23, %24, %cst_11 {dimension_numbers = #tpu.dot_dimension_numbers<[1], [1], [0], [0], [0, 0, 1, 0], [], []>} : vector<8x32xf32>, vector<8x32xf32>, vector<8x8xf32> -> vector<8x8xf32>
    %cst_12 = arith.constant 0.176776692 : f32
    %27 = vector.broadcast %cst_12 : f32 to vector<8x8xf32>
    %28 = arith.mulf %26, %27 : vector<8x8xf32>
    %cst_13 = arith.constant dense<0xFF800000> : vector<8xf32>
    %29 = vector.multi_reduction <maximumf>, %28, %cst_13 [1] : vector<8x8xf32> to vector<8xf32>
    %30 = vector.shape_cast %29 : vector<8xf32> to vector<8x1xf32>
    %31 = vector.broadcast %30 : vector<8x1xf32> to vector<8x8xf32>
    %32 = arith.subf %28, %31 : vector<8x8xf32>
    %33 = math.exp %32 : vector<8x8xf32>
    %cst_14 = arith.constant dense<0.000000e+00> : vector<8xf32>
    %34 = vector.multi_reduction <add>, %33, %cst_14 [1] : vector<8x8xf32> to vector<8xf32>
    %35 = vector.shape_cast %34 : vector<8xf32> to vector<8x1xf32>
    %36 = vector.broadcast %35 : vector<8x1xf32> to vector<8x8xf32>
    %37 = arith.divf %33, %36 : vector<8x8xf32>
    %cst_15 = arith.constant dense<0.000000e+00> : vector<8x32xf32>
    %38 = tpu.matmul %37, %25, %cst_15 {dimension_numbers = #tpu.dot_dimension_numbers<[1], [0], [0], [1], [0, 0, 1, 1], [], []>} : vector<8x8xf32>, vector<8x32xf32>, vector<8x32xf32> -> vector<8x32xf32>
    %39 = vector.extract_strided_slice %6 {offsets = [0, 64], sizes = [8, 32], strides = [1, 1]} : vector<8x384xf32> to vector<8x32xf32>
    %40 = vector.extract_strided_slice %6 {offsets = [0, 192], sizes = [8, 32], strides = [1, 1]} : vector<8x384xf32> to vector<8x32xf32>
    %41 = vector.extract_strided_slice %6 {offsets = [0, 320], sizes = [8, 32], strides = [1, 1]} : vector<8x384xf32> to vector<8x32xf32>
    %cst_16 = arith.constant dense<0.000000e+00> : vector<8x8xf32>
    %42 = tpu.matmul %39, %40, %cst_16 {dimension_numbers = #tpu.dot_dimension_numbers<[1], [1], [0], [0], [0, 0, 1, 0], [], []>} : vector<8x32xf32>, vector<8x32xf32>, vector<8x8xf32> -> vector<8x8xf32>
    %cst_17 = arith.constant 0.176776692 : f32
    %43 = vector.broadcast %cst_17 : f32 to vector<8x8xf32>
    %44 = arith.mulf %42, %43 : vector<8x8xf32>
    %cst_18 = arith.constant dense<0xFF800000> : vector<8xf32>
    %45 = vector.multi_reduction <maximumf>, %44, %cst_18 [1] : vector<8x8xf32> to vector<8xf32>
    %46 = vector.shape_cast %45 : vector<8xf32> to vector<8x1xf32>
    %47 = vector.broadcast %46 : vector<8x1xf32> to vector<8x8xf32>
    %48 = arith.subf %44, %47 : vector<8x8xf32>
    %49 = math.exp %48 : vector<8x8xf32>
    %cst_19 = arith.constant dense<0.000000e+00> : vector<8xf32>
    %50 = vector.multi_reduction <add>, %49, %cst_19 [1] : vector<8x8xf32> to vector<8xf32>
    %51 = vector.shape_cast %50 : vector<8xf32> to vector<8x1xf32>
    %52 = vector.broadcast %51 : vector<8x1xf32> to vector<8x8xf32>
    %53 = arith.divf %49, %52 : vector<8x8xf32>
    %cst_20 = arith.constant dense<0.000000e+00> : vector<8x32xf32>
    %54 = tpu.matmul %53, %41, %cst_20 {dimension_numbers = #tpu.dot_dimension_numbers<[1], [0], [0], [1], [0, 0, 1, 1], [], []>} : vector<8x8xf32>, vector<8x32xf32>, vector<8x32xf32> -> vector<8x32xf32>
    %55 = vector.extract_strided_slice %6 {offsets = [0, 96], sizes = [8, 32], strides = [1, 1]} : vector<8x384xf32> to vector<8x32xf32>
    %56 = vector.extract_strided_slice %6 {offsets = [0, 224], sizes = [8, 32], strides = [1, 1]} : vector<8x384xf32> to vector<8x32xf32>
    %57 = vector.extract_strided_slice %6 {offsets = [0, 352], sizes = [8, 32], strides = [1, 1]} : vector<8x384xf32> to vector<8x32xf32>
    %cst_21 = arith.constant dense<0.000000e+00> : vector<8x8xf32>
    %58 = tpu.matmul %55, %56, %cst_21 {dimension_numbers = #tpu.dot_dimension_numbers<[1], [1], [0], [0], [0, 0, 1, 0], [], []>} : vector<8x32xf32>, vector<8x32xf32>, vector<8x8xf32> -> vector<8x8xf32>
    %cst_22 = arith.constant 0.176776692 : f32
    %59 = vector.broadcast %cst_22 : f32 to vector<8x8xf32>
    %60 = arith.mulf %58, %59 : vector<8x8xf32>
    %cst_23 = arith.constant dense<0xFF800000> : vector<8xf32>
    %61 = vector.multi_reduction <maximumf>, %60, %cst_23 [1] : vector<8x8xf32> to vector<8xf32>
    %62 = vector.shape_cast %61 : vector<8xf32> to vector<8x1xf32>
    %63 = vector.broadcast %62 : vector<8x1xf32> to vector<8x8xf32>
    %64 = arith.subf %60, %63 : vector<8x8xf32>
    %65 = math.exp %64 : vector<8x8xf32>
    %cst_24 = arith.constant dense<0.000000e+00> : vector<8xf32>
    %66 = vector.multi_reduction <add>, %65, %cst_24 [1] : vector<8x8xf32> to vector<8xf32>
    %67 = vector.shape_cast %66 : vector<8xf32> to vector<8x1xf32>
    %68 = vector.broadcast %67 : vector<8x1xf32> to vector<8x8xf32>
    %69 = arith.divf %65, %68 : vector<8x8xf32>
    %cst_25 = arith.constant dense<0.000000e+00> : vector<8x32xf32>
    %70 = tpu.matmul %69, %57, %cst_25 {dimension_numbers = #tpu.dot_dimension_numbers<[1], [0], [0], [1], [0, 0, 1, 1], [], []>} : vector<8x8xf32>, vector<8x32xf32>, vector<8x32xf32> -> vector<8x32xf32>
    %71 = tpu.concatenate %22, %38, %54, %70 in 1 : vector<8x32xf32>, vector<8x32xf32>, vector<8x32xf32>, vector<8x32xf32> -> vector<8x128xf32>
    %c0_26 = arith.constant 0 : index
    %c0_27 = arith.constant 0 : index
    %72 = vector.load %arg4[%c0_26, %c0_27] : memref<128x128xf32, #tpu.memory_space<vmem>>, vector<128x128xf32>
    %cst_28 = arith.constant dense<0.000000e+00> : vector<8x128xf32>
    %73 = tpu.matmul %71, %72, %cst_28 {dimension_numbers = #tpu.dot_dimension_numbers<[1], [0], [0], [1], [0, 0, 1, 1], [], []>} : vector<8x128xf32>, vector<128x128xf32>, vector<8x128xf32> -> vector<8x128xf32>
    %c0_29 = arith.constant 0 : index
    %c0_30 = arith.constant 0 : index
    %74 = vector.load %arg5[%c0_29, %c0_30] : memref<1x128xf32, #tpu.memory_space<vmem>>, vector<1x128xf32>
    %75 = vector.broadcast %74 : vector<1x128xf32> to vector<8x128xf32>
    %76 = arith.addf %73, %75 : vector<8x128xf32>
    %c0_31 = arith.constant 0 : index
    %c0_32 = arith.constant 0 : index
    %c0_33 = arith.constant 0 : index
    %77 = vector.load %arg6[%c0_31, %c0_32, %c0_33] : memref<1x8x128xf32, #tpu.memory_space<vmem>>, vector<1x8x128xf32>
    %78 = vector.shape_cast %77 : vector<1x8x128xf32> to vector<8x128xf32>
    %79 = vector.shape_cast %76 : vector<8x128xf32> to vector<1x8x128xf32>
    tpu.vector_store %arg6[%c0_31, %c0_32, %c0_33], %79 {strides = array<i32>} : memref<1x8x128xf32, #tpu.memory_space<vmem>>, vector<1x8x128xf32>,
    return
  }
  func.func @transform_0(%arg0: i32) -> (i32, i32, i32) {
    %c0_i32 = arith.constant 0 : i32
    %c0_i32_0 = arith.constant 0 : i32
    %c0_i32_1 = arith.constant 0 : i32
    return %arg0, %c0_i32, %c0_i32_0 : i32, i32, i32
  }
  func.func @transform_1(%arg0: i32) -> (i32, i32) {
    %c0_i32 = arith.constant 0 : i32
    %c0_i32_0 = arith.constant 0 : i32
    %c0_i32_1 = arith.constant 0 : i32
    return %c0_i32, %c0_i32_0 : i32, i32
  }
  func.func @transform_2(%arg0: i32) -> (i32, i32) {
    %c0_i32 = arith.constant 0 : i32
    %c0_i32_0 = arith.constant 0 : i32
    %c0_i32_1 = arith.constant 0 : i32
    return %c0_i32, %c0_i32_0 : i32, i32
  }
  func.func @transform_3(%arg0: i32) -> (i32, i32) {
    %c0_i32 = arith.constant 0 : i32
    %c0_i32_0 = arith.constant 0 : i32
    %c0_i32_1 = arith.constant 0 : i32
    return %c0_i32, %c0_i32_0 : i32, i32
  }
  func.func @transform_4(%arg0: i32) -> (i32, i32) {
    %c0_i32 = arith.constant 0 : i32
    %c0_i32_0 = arith.constant 0 : i32
    %c0_i32_1 = arith.constant 0 : i32
    return %c0_i32, %c0_i32_0 : i32, i32
  }
  func.func @transform_5(%arg0: i32) -> (i32, i32, i32) {
    %c0_i32 = arith.constant 0 : i32
    %c0_i32_0 = arith.constant 0 : i32
    %c0_i32_1 = arith.constant 0 : i32
    return %arg0, %c0_i32, %c0_i32_0 : i32, i32, i32
  }
}

</mosaic_0001>

<bundles_post_ra>
// kernel: tpu_custom_call.1
= control target key start
LH: loop header
LB: loop body
LE: loop exit
PB: predicated region body
PF: predicated region fallthrough
CT: control target
= control target key end

     0   :  { %10 = vsyncpa [#allocation3], 0  ;;  %s2257_s0 = inlined_call_operand.hbm [shape: f32[2,8,128], index: 0, kind: input, shape index: {}]   ;;  %s2258_s1 = inlined_call_operand.hbm [shape: f32[128,384], index: 1, kind: input, shape index: {}]   ;;  %s2259_s2 = inlined_call_operand.vmem [shape: f32[1,384], index: 2, kind: input, shape index: {}]   ;;  %s2260_s3 = inlined_call_operand.hbm [shape: f32[128,128], index: 3, kind: input, shape index: {}]   ;;  %s2261_s4 = inlined_call_operand.vmem [shape: f32[1,128], index: 4, kind: input, shape index: {}]   ;;  %s2262_s5 = inlined_call_operand.hbm [shape: f32[2,8,128], index: 5, kind: output, shape index: {}]  }
   0x1   :  { %12 = vsyncpa [#allocation3 + $0x1], 0 }
   0x2   :  { %13 = vsyncpa [#allocation6], 0 }
   0x3   :  { %14 = vsyncpa [#allocation4], 0 }
   0x4   :  { %16 = vsyncpa [#allocation4 + $0x1], 0  ;;  %s1916_s18 = smov 0   ;;  %s1918_s19 = smov 0  }
   0x5   :  { %s1920_s20 = smov 0   ;;  %s1922_s21 = smov 0  }
   0x6 LB: > { %s1937_s22 = sadd.s32 4294967295, %s1870_s21   ;;  %s1352_s23 = sadd.s32 4294967294, %s1870_s21   ;;  %s1870_s21 = sphi %s1922_s21, %s2282_s21   ;;  %s1866_s20 = sphi %s1920_s20, %s2281_s20   ;;  %s1862_s19 = sphi %s1918_s19, %s2280_s19   ;;  %s1858_s18 = sphi %s1916_s18, %s2279_s18  }
   0x7   : > { %p42_p0 = scmp.ne.s32.totalorder %s1862_s19, %s1858_s18  ;;  %p2263_p1 = scmp.eq.s32.totalorder %s1937_s22, 0 }
   0x8   : > { %p156_p3 = scmp.eq.s32.totalorder %s1352_s23, 1  ;;  %p1353_p5 = scmp.ge.s32.totalorder %s1870_s21, 1 }
   0x9   : > { %p1946_p4 = por %p2263_p1, %p42_p0  ;;  %p163_p7 = scmp.lt.s32.totalorder %s1870_s21, 3 }
   0xa   : > { %p1951_p6 = por %p156_p3, %p42_p0  ;;  %s1872_s27 = smov [#allocation5]  }
   0xb   : > { %s2266_s24 = scalar_select %p1946_p4, 1, 0 }
   0xc   : > { %s2267_s25 = scalar_select %p1951_p6, 1, 0 }
   0xd   : > { %p1956_p8 = pnand %p1353_p5, %p163_p7  ;;  %s175_s28 = sshll.u32 %s1872_s27, 4  ;;  %s1960_s28 = int_to_ptr.vmem [resolvable:$true] %s175_s28 }
   0xe   : > { %s1873_s30 = smov [#allocation7]   ;;  %s1714_s9 = scalar_lea.hbm %s2258_s1, 6144 }
   0xf   : > { %p1633_p9 = pneg %p1956_p8  ;;  %s191_s6 = sshll.u32 %s1873_s30, 4  ;;  %s1971_s6 = int_to_ptr.vmem [resolvable:$true] %s191_s6 }
  0x10   : > { %p1715_p12 = scmp.ne.s32.totalorder %s2258_s1, %s1714_s9  ;;  %p1721_p5 = scmp.lt.u32.totalorder %s1714_s9, %s2258_s1 }
  0x11   : > { %p1967_p11 = pnand %p1633_p9, %p2263_p1 }
  0x13   : > { %p1716_p13 = pneg %p1967_p11 }
  0x15   : > { %p1717_p0 = pnand %p1716_p13, %p1715_p12 }
  0x17   : > { %p1718_p3 = pneg %p1717_p0 }
  0x19   : > { %p1723_p7 = pnand %p1721_p5, %p1718_p3 }
  0x1b   : > { %1726 = shalt.err (!%p1723_p7)
}
  0x1c   : > { %s1727_s14 = scalar_lea.vmem %s1960_s28, 6144  ;;  %p1735_p2 = scmp.lt.s32.totalorder %s1960_s28, %s1960_s28 }
  0x1d   : > { %p1728_p9 = scmp.ne.s32.totalorder %s1960_s28, %s1727_s14  ;;  %p1736_p12 = scmp.lt.s32.totalorder %s1727_s14, %s1727_s14 }
  0x1f   : > { %p1730_p10 = pnand %p1728_p9, %p1716_p13  ;;  %p1737_p0 = por %p1736_p12, %p1735_p2 }
  0x21   : > { %p1731_p1 = pneg %p1730_p10 }
  0x23   : > { %p1738_p6 = pnand %p1737_p0, %p1731_p1 }
  0x25   : > { %1741 = shalt.err (!%p1738_p6)
}
  0x26   : > { %s1874_s15 = smov 384   ;;  %s1875_s16 = smov 24  }
  0x27   : > { %1636 = dma.hbm_to_vmem [thread:$0]  (!%p1967_p11), %s2258_s1, 6144, %s1960_s28, [#allocation6], %s1874_s15, %s1874_s15, %s1875_s16  }
  0x28   : > { %s1742_s7 = scalar_lea.hbm %s2260_s3, 2048 }
  0x29   : > { %p1743_p2 = scmp.ne.s32.totalorder %s2260_s3, %s1742_s7  ;;  %p1749_p10 = scmp.lt.u32.totalorder %s1742_s7, %s2260_s3 }
  0x2b   : > { %p1745_p1 = pnand %p1743_p2, %p1716_p13 }
  0x2d   : > { %p1746_p6 = pneg %p1745_p1 }
  0x2f   : > { %p1751_p3 = pnand %p1749_p10, %p1746_p6 }
  0x31   : > { %1754 = shalt.err (!%p1751_p3)
}
  0x32   : > { %s1755_s28 = scalar_lea.vmem %s1971_s6, 2048  ;;  %p1763_p12 = scmp.lt.s32.totalorder %s1971_s6, %s1971_s6 }
  0x33   : > { %p1756_p5 = scmp.ne.s32.totalorder %s1971_s6, %s1755_s28  ;;  %p1764_p0 = scmp.lt.s32.totalorder %s1755_s28, %s1755_s28 }
  0x35   : > { %p1758_p7 = pnand %p1756_p5, %p1716_p13  ;;  %p1765_p2 = por %p1764_p0, %p1763_p12 }
  0x37   : > { %p1759_p9 = pneg %p1758_p7 }
  0x39   : > { %p1766_p1 = pnand %p1765_p2, %p1759_p9 }
  0x3b   : > { %1769 = shalt.err (!%p1766_p1)
}
  0x3c   : > { %s1876_s12 = smov 128   ;;  %s1877_s13 = smov 8  }
  0x3d   : > { %1639 = dma.hbm_to_vmem [thread:$0]  (!%p1967_p11), %s2260_s3, 2048, %s1971_s6, [#allocation6], %s1876_s12, %s1876_s12, %s1877_s13  }
  0x3e   : > { %s2026_s16 = sadd.s32 1, %s1870_s21   ;;  %s29_s23 = sadd.s32 1, %s1866_s20 }
  0x3f   : > { %s26_s17 = ssub.s32 %s1870_s21, %s2026_s16  ;;  %p36_p6 = scmp.ne.s32.totalorder %s1866_s20, %s1862_s19 }
  0x40   : > { %p27_p13 = scmp.eq.s32.totalorder %s26_s17, 0  ;;  %p37_p10 = scmp.eq.s32.totalorder %s1870_s21, 0 }
  0x41   : > { %p2270_p5 = scmp.eq.s32.totalorder %s1937_s22, 1  ;;  %p1650_p9 = scmp.lt.s32.totalorder %s1870_s21, 2 }
  0x42   : > { %s2035_s27 = scalar_select %p27_p13, %s1866_s20, %s29_s23  }
  0x43   : > { %p38_p3 = por %p37_p10, %p36_p6  ;;  %p2039_p7 = por %p2270_p5, %p36_p6 }
  0x44   : > { %s208_s29 = sand.u32 1, %s1866_s20   ;;  %s1358_s6 = sshll.u32 %s1870_s21, 7 }
  0x45   : > { %s2271_s30 = scalar_select %p2039_p7, 1, 0 }
  0x46   : > { %s1357_s7 = sshll.u32 %s208_s29, 3  ;;  %s2049_s10 = scalar_lea.hbm %s2257_s0, %s1358_s6 }
  0x47   : > { %s212_s11 = scalar_lea.vmem [#allocation2], %s1357_s7  ;;  %p2053_p11 = pnand %p1650_p9, %p38_p3 }
  0x48   : > { %s219_s28 = sshll.u32 %s212_s11, 4  ;;  %s209_s13 = scalar_lea.sflag [#allocation3], %s208_s29  ;;  %s2051_s28 = int_to_ptr.vmem [resolvable:$true] %s219_s28 }
  0x49   : > { %s1770_s14 = scalar_lea.hbm %s2049_s10, 128  ;;  %p1772_p0 = pneg %p2053_p11 }
  0x4a   : > { %p1771_p12 = scmp.ne.s32.totalorder %s2049_s10, %s1770_s14  ;;  %s1775_s23 = scalar_lea.hbm %s2257_s0, 256 }
  0x4b   : > { %p1776_p13 = scmp.lt.u32.totalorder %s2049_s10, %s2257_s0  ;;  %p1777_p6 = scmp.lt.u32.totalorder %s1775_s23, %s1770_s14 }
  0x4c   : > { %p1773_p2 = pnand %p1772_p0, %p1771_p12  ;;  %p1779_p3 = scmp.lt.u32.totalorder %s1770_s14, %s2049_s10 }
  0x4d   : > { %p1778_p10 = por %p1777_p6, %p1776_p13 }
  0x4e   : > { %p1774_p1 = pneg %p1773_p2 }
  0x4f   : > { %p1780_p5 = por %p1779_p3, %p1778_p10 }
  0x51   : > { %p1781_p9 = pnand %p1780_p5, %p1774_p1 }
  0x53   : > { %1784 = shalt.err (!%p1781_p9)
}
  0x54   : > { %s1785_s29 = scalar_lea.vmem %s2051_s28, 128  ;;  %s1878_s8 = smov [#allocation2]  }
  0x55   : > { %p1786_p12 = scmp.ne.s32.totalorder %s2051_s28, %s1785_s29  ;;  %s1790_s9 = sshll.u32 %s1878_s8, 4  ;;  %s1791_s9 = int_to_ptr.vmem [resolvable:$false] %s1790_s9 }
  0x56   : > { %s1792_s11 = scalar_lea.vmem %s1791_s9, 256  ;;  %p1793_p4 = scmp.lt.s32.totalorder %s2051_s28, %s1791_s9 }
  0x57   : > { %p1788_p2 = pnand %p1786_p12, %p1772_p0  ;;  %p1794_p13 = scmp.lt.s32.totalorder %s1792_s11, %s1785_s29 }
  0x59   : > { %p1789_p7 = pneg %p1788_p2  ;;  %p1795_p6 = por %p1794_p13, %p1793_p4 }
  0x5b   : > { %p1796_p10 = pnand %p1795_p6, %p1789_p7 }
  0x5d   : > { %1799 = shalt.err (!%p1796_p10)
}
  0x5e   : > { %1643 = dma.hbm_to_vmem [thread:$0]  (!%p2053_p11), %s2049_s10, 128, %s2051_s28, %s209_s13  }
  0x5f   : > { %228 = sbr.rel (%p1956_p8) target bundleno = 3039 (0xbdf), region = 40  ;;  %s2085_s14 = sand.u32 (!%p1956_p8), 1, %s1862_s19  }
  0x60   : > { %s1360_s15 = sshll.u32 (!%p1956_p8), %s2085_s14, 3  ;;  %s231_s17 = scalar_lea.sflag (!%p1956_p8), [#allocation3], %s2085_s14 }
  0x61   : > { %s2091_s23 = scalar_lea.vmem (!%p1956_p8), [#allocation2], %s1360_s15  ;;  %p2273_p4 = scmp.ne.s32.totalorder (!%p1956_p8), %s2266_s24, 0 }
  0x66   : > { %1845 = dma.done.wait (%p2273_p4), %s231_s17, 128  }
  0x67   : > { %1847 = vsyncadd (%p2273_p4), %s231_s17, 4294967168  ;;  %p2274_p7 = scmp.eq.s32.totalorder %s1937_s22, 0 }
  0x69   : > { %1849 = dma.done.wait (%p2274_p7), [#allocation6], 8192   ;;  %p2275_p8 = pmov %p2274_p7 }
  0x6a   : > { %v1879_v0 = vmov 0.0   ;;  %v1880_v1 = vmov 0.0|0.0   ;;  %v271_v2 = vld [vmem:[#allocation5 + $0x8] sm:$0xff]  ;;  %v274_v3 = vld [vmem:[#allocation5 + $0x20] sm:$0xff]  ;;  %v273_v6 = vld [vmem:[#allocation5 + $0x18] sm:$0xff]  ;;  %vm1881_vm0 = vmmov 0  }
  0x6b   : > { %1851 = vsyncadd (%p2275_p8), [#allocation6], 4294959104  ;;  %399 = vmatprep.mubr.f32.mxu0 %v1879_v0  ;;  %1573 = vmatprep.subr.bf16.mxu1 %v1880_v1  ;;  %v270_v4 = vld [vmem:[#allocation5] sm:$0xff]  ;;  %v1541_v5 = vpack.c.bf16 %v274_v3, %v271_v2  ;;  %v277_v7 = vld [vmem:[#allocation5 + $0x38] sm:$0xff]  ;;  %vm476_vm1 = vcmask 261120   ;;  %s1882_s10 = smov 96  }
  0x6c   : > { %v280_v8 = vld [vmem:[#allocation5 + $0x50] sm:$0xff]  ;;  %v1543_v9 = vpack.c.bf16 %v273_v6, %v270_v4  ;;  %v279_v12 = vld [vmem:[#allocation5 + $0x48] sm:$0xff]  ;;  %v286_v14 = vld [vmem:[#allocation5 + $0x80] sm:$0xff]  ;;  %1463 = vmatprep.mubr.msk.f32.mxu1 %vm1881_vm0, %v1879_v0  ;;  %vm554_vm2 = vcmask 64512   ;;  %s1883_s28 = smov 64   ;;  %s1884_s12 = smov 32  }
  0x6d   : > { %v1545_v10 = vpack.c.bf16 %v280_v8, %v277_v7  ;;  %v276_v11 = vld [vmem:[#allocation5 + $0x30] sm:$0xff]  ;;  %v283_v13 = vld [vmem:[#allocation5 + $0x68] sm:$0xff]  ;;  %1542 = vmatprep.subr.bf16.mxu0 %v1541_v5  ;;  %v282_v17 = vld [vmem:[#allocation5 + $0x60] sm:$0xff]  ;;  %vm1151_vm3 = vcmask 523264   ;;  %vm1153_vm4 = vcmask 785408   ;;  %s1378_s6 = sshll.u32 %s1937_s22, 7 }
  0x6e   : > { %1544 = vmatpush1.bf16.msra.mxu0 %v1543_v9  ;;  %v1547_v15 = vpack.c.bf16 %v279_v12, %v276_v11  ;;  %v1549_v16 = vpack.c.bf16 %v286_v14, %v283_v13  ;;  %v285_v18 = vld [vmem:[#allocation5 + $0x78] sm:$0xff]  ;;  %v292_v20 = vld [vmem:[#allocation5 + $0xb0] sm:$0xff]  ;;  %v291_v24 = vld [vmem:[#allocation5 + $0xa8] sm:$0xff]  ;;  %v320_v13 = vlaneseq  ;;  %s268_s29 = scalar_lea.vmem [#allocation8], %s1360_s15  ;;  %s2213_s17 = scalar_lea.hbm %s2262_s5, %s1378_s6 }
  0x6f   : > { %1546 = vmatprep.subr.bf16.mxu0 %v1545_v10  ;;  %v289_v19 = vld [vmem:[#allocation5 + $0x98] sm:$0xff]  ;;  %v1551_v21 = vpack.c.bf16 %v285_v18, %v282_v17  ;;  %v288_v23 = vld [vmem:[#allocation5 + $0x90] sm:$0xff]  ;;  %v295_v25 = vld [vmem:[#allocation5 + $0xc8] sm:$0xff]  ;;  %s1263_s8 = sshll.u32 %s268_s29, 4  ;;  %p2276_p0 = scmp.ne.s32.totalorder %s2271_s30, 0  ;;  %s2215_s8 = int_to_ptr.vmem [resolvable:$true] %s1263_s8 }
  0x70   : > { %v1553_v22 = vpack.c.bf16 %v292_v20, %v289_v19  ;;  %v298_v26 = vld [vmem:[#allocation5 + $0xe0] sm:$0xff]  ;;  %v272_v27 = vld [vmem:[#allocation5 + $0x10] sm:$0xff]  ;;  %v275_v28 = vld [vmem:[#allocation5 + $0x28] sm:$0xff]  ;;  %v1555_v30 = vpack.c.bf16 %v291_v24, %v288_v23  ;;  %v321_v14 = vshrl.u32 %v320_v13, 7  ;;  %s1800_s24 = scalar_lea.vmem %s2215_s8, 128  ;;  %s1885_s22 = smov [#allocation8]  }
  0x71   : > { %v278_v29 = vld [vmem:[#allocation5 + $0x40] sm:$0xff]  ;;  %v1574_v31 = vpack.c.bf16 %v275_v28, %v272_v27  ;;  %v281_v32 = vld [vmem:[#allocation5 + $0x58] sm:$0xff]  ;;  %v1557_v33 = vpack.c.bf16 %v298_v26, %v295_v25  ;;  %v304_v37 = vld [vmem:[#allocation5 + $0x110] sm:$0xff]  ;;  %p1801_p11 = scmp.ne.s32.totalorder %s2215_s8, %s1800_s24  ;;  %s1804_s15 = sshll.u32 %s1885_s22, 4  ;;  %s1805_s15 = int_to_ptr.vmem [resolvable:$false] %s1804_s15 }
  0x72   : > { %1548 = vmatpush1.bf16.msra.mxu0 %v1547_v15  ;;  %v294_v34 = vld [vmem:[#allocation5 + $0xc0] sm:$0xff]  ;;  %v297_v35 = vld [vmem:[#allocation5 + $0xd8] sm:$0xff]  ;;  %v1577_v38 = vpack.c.bf16 %v281_v32, %v278_v29  ;;  %v284_v39 = vld [vmem:[#allocation5 + $0x70] sm:$0xff]  ;;  %v326_v15 = vsub.s32 1, %v321_v14  ;;  %v322_v17 = vsub.s32 0, %v321_v14  ;;  %v330_v24 = vsub.s32 2, %v321_v14  ;;  %p1807_p5 = scmp.lt.s32.totalorder %s2215_s8, %s1805_s15 }
  0x73   : > { %1550 = vmatprep.subr.bf16.mxu0 %v1549_v16  ;;  %v301_v36 = vld [vmem:[#allocation5 + $0xf8] sm:$0xff]  ;;  %1575 = vmatpush3.bf16.msra.mxu1 %v1574_v31  ;;  %v287_v40 = vld [vmem:[#allocation5 + $0x88] sm:$0xff]  ;;  %v1559_v41 = vpack.c.bf16 %v297_v35, %v294_v34  ;;  %v300_v43 = vld [vmem:[#allocation5 + $0xf0] sm:$0xff]  ;;  %p1802_p1 = pnand %p1801_p11, %p2276_p0  ;;  %s1806_s26 = scalar_lea.vmem %s1805_s15, 256 }
  0x74   : > { %1576 = vmatprep.subr.bf16.mxu1 %v1880_v1  ;;  %v1561_v42 = vpack.c.bf16 %v304_v37, %v301_v36  ;;  %v303_v44 = vld [vmem:[#allocation5 + $0x108] sm:$0xff]  ;;  %v310_v46 = vld [vmem:[#allocation5 + $0x140] sm:$0xff]  ;;  %v1580_v47 = vpack.c.bf16 %v287_v40, %v284_v39  ;;  %v293_v49 = vld [vmem:[#allocation5 + $0xb8] sm:$0xff]  ;;  %p1808_p9 = scmp.lt.s32.totalorder %s1806_s26, %s1800_s24 }
  0x75   : > { %v307_v45 = vld [vmem:[#allocation5 + $0x128] sm:$0xff]  ;;  %v290_v48 = vld [vmem:[#allocation5 + $0xa0] sm:$0xff]  ;;  %v1563_v50 = vpack.c.bf16 %v303_v44, %v300_v43  ;;  %v309_v53 = vld [vmem:[#allocation5 + $0x138] sm:$0xff]  ;;  %p1803_p3 = pneg %p1802_p1 }
  0x76   : > { %1552 = vmatpush1.bf16.msra.mxu0 %v1551_v21  ;;  %v1565_v51 = vpack.c.bf16 %v310_v46, %v307_v45  ;;  %v306_v52 = vld [vmem:[#allocation5 + $0x120] sm:$0xff]  ;;  %v313_v54 = vld [vmem:[#allocation5 + $0x158] sm:$0xff]  ;;  %v316_v55 = vld [vmem:[#allocation5 + $0x170] sm:$0xff]  ;;  %v1583_v56 = vpack.c.bf16 %v293_v49, %v290_v48  ;;  %p1809_p12 = por %p1808_p9, %p1807_p5 }
  0x77   : > { %1554 = vmatprep.subr.bf16.mxu0 %v1553_v22  ;;  %1578 = vmatpush3.bf16.msra.mxu1 %v1577_v38  ;;  %v296_v57 = vld [vmem:[#allocation5 + $0xd0] sm:$0xff]  ;;  %v299_v58 = vld [vmem:[#allocation5 + $0xe8] sm:$0xff]  ;;  %v1567_v59 = vpack.c.bf16 %v309_v53, %v306_v52  ;;  %v1569_v60 = vpack.c.bf16 %v316_v55, %v313_v54  ;;  %v302_v2 = vld [vmem:[#allocation5 + $0x100] sm:$0xff] }
  0x78   : > { %1579 = vmatprep.subr.bf16.mxu1 %v1880_v1  ;;  %v312_v61 = vld [vmem:[#allocation5 + $0x150] sm:$0xff]  ;;  %v315_v62 = vld [vmem:[#allocation5 + $0x168] sm:$0xff]  ;;  %v1586_v63 = vpack.c.bf16 %v299_v58, %v296_v57  ;;  %v305_v3 = vld [vmem:[#allocation5 + $0x118] sm:$0xff]  ;;  %p1810_p2 = pnand %p1809_p12, %p1803_p3 }
  0x79   : > { %v1571_v4 = vpack.c.bf16 %v315_v62, %v312_v61  ;;  %v1589_v5 = vpack.c.bf16 %v305_v3, %v302_v2  ;;  %v308_v6 = vld [vmem:[#allocation5 + $0x130] sm:$0xff]  ;;  %v311_v7 = vld [vmem:[#allocation5 + $0x148] sm:$0xff]  ;;  %v314_v10 = vld [vmem:[#allocation5 + $0x160] sm:$0xff] }
  0x7a   : > { %1556 = vmatpush1.bf16.msra.mxu0 %v1555_v30  ;;  %v269_v8 = vld [vmem:[%s2091_s23] sm:$0xff]  ;;  %v1592_v9 = vpack.c.bf16 %v311_v7, %v308_v6  ;;  %s1250_s23 = scalar_lea.sflag [#allocation4], %s2085_s14 }
  0x7b   : > { %1558 = vmatprep.subr.bf16.mxu0 %v1557_v33  ;;  %1581 = vmatpush3.bf16.msra.mxu1 %v1580_v47  ;;  %v317_v11 = vld [vmem:[#allocation5 + $0x178] sm:$0xff]  ;;  %v318_v16 = vld [vmem:[%s2259_s2] sm:$0x7] }
  0x7c   : > { %1582 = vmatprep.subr.bf16.mxu1 %v1880_v1  ;;  %v1595_v12 = vpack.c.bf16 %v317_v11, %v314_v10  ;;  %v327_v18 = vrot.slane %v318_v16, %v326_v15  ;;  %v323_v20 = vrot.slane %v318_v16, %v322_v17  ;;  %v331_v25 = vrot.slane %v318_v16, %v330_v24 }
  0x7e   : > { %1560 = vmatpush1.bf16.msra.mxu0 %v1559_v41 }
  0x7f   : > { %1562 = vmatprep.subr.bf16.mxu0 %v1561_v42  ;;  %1584 = vmatpush3.bf16.msra.mxu1 %v1583_v56 }
  0x80   : > { %1585 = vmatprep.subr.bf16.mxu1 %v1880_v1 }
  0x82   : > { %1564 = vmatpush1.bf16.msra.mxu0 %v1563_v50 }
  0x83   : > { %1566 = vmatprep.subr.bf16.mxu0 %v1565_v51  ;;  %1587 = vmatpush3.bf16.msra.mxu1 %v1586_v63 }
  0x84   : > { %1588 = vmatprep.subr.bf16.mxu1 %v1880_v1 }
  0x86   : > { %1568 = vmatpush1.bf16.msra.mxu0 %v1567_v59 }
  0x87   : > { %1570 = vmatprep.subr.bf16.mxu0 %v1569_v60  ;;  %1590 = vmatpush3.bf16.msra.mxu1 %v1589_v5 }
  0x88   : > { %1591 = vmatprep.subr.bf16.mxu1 %v1880_v1 }
  0x8a   : > { %1572 = vmatpush1.bf16.msra.mxu0 %v1571_v4 }
  0x8b   : > { %1597 = vmatprep.subr.bf16.mxu0 %v1880_v1  ;;  %1593 = vmatpush3.bf16.msra.mxu1 %v1592_v9 }
  0x8c   : > { %1594 = vmatprep.subr.bf16.mxu1 %v1880_v1 }
  0x8d   : > { %400 = vmatmul.mubr.f32.vlgmr.msra.gmra.mrb[0].mxu0 %v269_v8 }
  0x8e   : > { %1538 = vmatprep.mubr.msk.f32.mxu0 %vm1881_vm0, %v1879_v0 }
  0x8f   : > { %1596 = vmatpush3.bf16.msra.mxu1 %v1595_v12 }
  0x90   : > { %1466 = vmatprep.subr.mxu1 %v1879_v0 }
  0x92   : > { %1464 = vmatmul.mubr.f32.vlgmr.msra.gmra.mrb[0].mxu1 %v269_v8 }
  0x93   : > { %1468 = vmatprep.mubr.msk.f32.mxu1 %vm1881_vm0, %v1879_v0 }
 0x160   : > { %v401_v19 = vpop.f32.mrb[0].mxu0 }
 0x161   : > { %v403_v21 = vpop.f32.mrb[1].mxu0  ;;  %v2128_v23 = vadd.f32 %v401_v19, %v323_v20 }
 0x162   : > { %v2122_v22 = vadd.f32 %v403_v21, %v327_v18 }
 0x164   : > { %641 = vrot.lane.b32.xlu1 %v2122_v22, %s1882_s10  ;;  %1467 = vmatpush3.xpose.msk.msra.mxu1 %vm476_vm1, %v2122_v22 }
 0x165   : > { %1471 = vmatprep.subr.mxu1 %v1879_v0  ;;  %v472_v26 = vpop.f32.mrb[0].mxu1 }
 0x166   : > { %v2137_v27 = vadd.f32 %v472_v26, %v331_v25  ;;  %v1465_v28 = vpop.f32.mrb[1].mxu1 }
 0x167   : > { %1469 = vmatmul.mubr.msk.f32.vlgmr.msra.gmra.mrb[2].mxu1 %vm476_vm1, %v2128_v23 }
 0x168   : > { %639 = vrot.lane.b32.xlu1 %v2128_v23, %s1882_s10  ;;  %1473 = vmatprep.mubr.msk.f32.mxu1 %vm1881_vm0, %v1879_v0 }
 0x169   : > { %1472 = vmatpush3.msra.mxu1 %v2137_v27 }
 0x16a   : > { %1476 = vmatprep.subr.mxu1 %v1879_v0 }
 0x1d6   : > { %v642_v40 = vpop.permute.xlu1 %641 }
 0x1da   : > { %v640_v42 = vpop.permute.xlu1 %639 }
 0x23a   : > { %v549_v29 = vpop.f32.mrb[2].mxu1 }
 0x23b   : > { %v553_v30 = vmul.f32 0.17677669, %v549_v29  ;;  %v1470_v31 = vpop.f32.mrb[3].mxu1 }
 0x23c   : > { %v1157_v31 = vld [vmem:[#allocation7 + $0x10] sm:$0xff] }
 0x23d   : > { %v555_v32 = vsel %vm554_vm2, %v553_v30, -inf }
 0x23e   : > { %556 = vmax.xlane.f32.xlu0 %v555_v32 }
 0x2cb   : > { %v557_v33 = vpop.xlane.xlu0 %556 }
 0x2cc   : > { %v558_v34 = vsub.f32 %v553_v30, %v557_v33  ;;  %v1156_v30 = vld [vmem:[#allocation7 + $0x8] sm:$0xff]  ;;  %v1158_v33 = vld [vmem:[#allocation7 + $0x18] sm:$0xff] }
 0x2ce   : > { %v559_v35 = vmul.f32 1.442695, %v558_v34  ;;  %v1601_v34 = vpack.c.bf16 %v1158_v33, %v1157_v31 }
 0x2d0   : > { %1698 = vpow2.f32 %v559_v35  ;;  %v1159_v35 = vld [vmem:[#allocation7 + $0x20] sm:$0xff] }
 0x2da   : > { %v1699_v36 = vpop.eup %1698 }
 0x2db   : > { %v561_v37 = vsel %vm554_vm2, %v1699_v36, 0.0 }
 0x2dc   : > { %562 = vadd.xlane.f32.xlu0 %v561_v37 }
 0x369   : > { %v563_v38 = vpop.xlane.xlu0 %562 }
 0x36a   : > { %1700 = vrcp.f32 %v563_v38  ;;  %v1161_v38 = vld [vmem:[#allocation7 + $0x30] sm:$0xff] }
 0x374   : > { %v1701_v39 = vpop.eup %1700 }
 0x375   : > { %v565_v41 = vmul.f32 %v1701_v39, %v1699_v36  ;;  %v1160_v36 = vld [vmem:[#allocation7 + $0x28] sm:$0xff]  ;;  %v1162_v39 = vld [vmem:[#allocation7 + $0x38] sm:$0xff] }
 0x376   : > { %v1604_v37 = vpack.c.bf16 %v1160_v36, %v1159_v35 }
 0x377   : > { %1474 = vmatmul.mubr.msk.f32.vlgmr.msra.gmra.mrb[4].mxu1 %vm554_vm2, %v565_v41  ;;  %v1163_v41 = vld [vmem:[#allocation7 + $0x40] sm:$0xff] }
 0x378   : > { %1477 = vmatpush3.xpose.msk.msra.mxu1 %vm476_vm1, %v642_v40  ;;  %1478 = vmatprep.mubr.msk.f32.mxu1 %vm1881_vm0, %v1879_v0  ;;  %v1607_v40 = vpack.c.bf16 %v1162_v39, %v1161_v38 }
 0x379   : > { %1481 = vmatprep.subr.mxu1 %v1879_v0 }
 0x37b   : > { %1479 = vmatmul.mubr.msk.f32.vlgmr.msra.gmra.mrb[6].mxu1 %vm476_vm1, %v640_v42  ;;  %v1164_v42 = vld [vmem:[#allocation7 + $0x48] sm:$0xff] }
 0x37c   : > { %1483 = vmatprep.mubr.msk.f32.mxu1 %vm1881_vm0, %v1879_v0 }
 0x44a   : > { %v2151_v43 = vpop.f32.mrb[4].mxu1 }
 0x44b   : > { %v1475_v44 = vpop.f32.mrb[5].mxu1 }
 0x44c   : > { %v1610_v44 = vpack.c.bf16 %v1164_v42, %v1163_v41 }
 0x44e   : > { %v713_v45 = vpop.f32.mrb[6].mxu1 }
 0x44f   : > { %v717_v46 = vmul.f32 0.17677669, %v713_v45  ;;  %v1480_v47 = vpop.f32.mrb[7].mxu1  ;;  %v1165_v45 = vld [vmem:[#allocation7 + $0x50] sm:$0xff] }
 0x451   : > { %v718_v48 = vsel %vm554_vm2, %v717_v46, -inf }
 0x452   : > { %719 = vmax.xlane.f32.xlu0 %v718_v48  ;;  %v1167_v48 = vld [vmem:[#allocation7 + $0x60] sm:$0xff] }
 0x468   : > { %730 = vrot.lane.b32.xlu0 %v2137_v27, %s1882_s10 }
 0x46c   : > { %808 = vrot.lane.b32.xlu0 %v2122_v22, %s1883_s28 }
 0x470   : > { %806 = vrot.lane.b32.xlu0 %v2128_v23, %s1883_s28 }
 0x4df   : > { %v720_v49 = vpop.xlane.xlu0 %719 }
 0x4e0   : > { %v721_v50 = vsub.f32 %v717_v46, %v720_v49  ;;  %v1166_v46 = vld [vmem:[#allocation7 + $0x58] sm:$0xff]  ;;  %v1168_v49 = vld [vmem:[#allocation7 + $0x68] sm:$0xff] }
 0x4e1   : > { %v1613_v47 = vpack.c.bf16 %v1166_v46, %v1165_v45 }
 0x4e2   : > { %v722_v51 = vmul.f32 1.442695, %v721_v50  ;;  %v1616_v50 = vpack.c.bf16 %v1168_v49, %v1167_v48 }
 0x4e3   : > { %v731_v52 = vpop.permute.xlu0 %730 }
 0x4e4   : > { %1702 = vpow2.f32 %v722_v51  ;;  %1482 = vmatpush3.msra.mxu1 %v731_v52  ;;  %v1169_v51 = vld [vmem:[#allocation7 + $0x70] sm:$0xff]  ;;  %v1170_v52 = vld [vmem:[#allocation7 + $0x78] sm:$0xff] }
 0x4e5   : > { %1486 = vmatprep.subr.mxu1 %v1879_v0 }
 0x4e7   : > { %v809_v57 = vpop.permute.xlu0 %808 }
 0x4eb   : > { %v807_v59 = vpop.permute.xlu0 %806 }
 0x4ee   : > { %v1703_v53 = vpop.eup %1702 }
 0x4ef   : > { %v724_v54 = vsel %vm554_vm2, %v1703_v53, 0.0 }
 0x4f0   : > { %725 = vadd.xlane.f32.xlu1 %v724_v54 }
 0x501   : > { %896 = vrot.lane.b32.xlu1 %v2137_v27, %s1883_s28 }
 0x505   : > { %974 = vrot.lane.b32.xlu1 %v2122_v22, %s1884_s12 }
 0x57d   : > { %v726_v55 = vpop.xlane.xlu1 %725 }
 0x57e   : > { %1704 = vrcp.f32 %v726_v55 }
 0x581   : > { %v897_v60 = vpop.permute.xlu1 %896 }
 0x585   : > { %v975_v10 = vpop.permute.xlu1 %974 }
 0x588   : > { %v1705_v56 = vpop.eup %1704 }
 0x589   : > { %v728_v58 = vmul.f32 %v1705_v56, %v1703_v53  ;;  %v1619_v53 = vpack.c.bf16 %v1170_v52, %v1169_v51 }
 0x58b   : > { %1484 = vmatmul.mubr.msk.f32.vlgmr.msra.gmra.mrb[8].mxu1 %vm554_vm2, %v728_v58 }
 0x58c   : > { %1487 = vmatpush3.xpose.msk.msra.mxu1 %vm476_vm1, %v809_v57  ;;  %1488 = vmatprep.mubr.msk.f32.mxu1 %vm1881_vm0, %v1879_v0 }
 0x58d   : > { %1491 = vmatprep.subr.mxu1 %v1879_v0 }
 0x58f   : > { %1489 = vmatmul.mubr.msk.f32.vlgmr.msra.gmra.mrb[10].mxu1 %vm476_vm1, %v807_v59 }
 0x590   : > { %1492 = vmatpush3.msra.mxu1 %v897_v60  ;;  %1493 = vmatprep.mubr.msk.f32.mxu1 %vm1881_vm0, %v1879_v0 }
 0x591   : > { %1496 = vmatprep.subr.mxu1 %v1879_v0 }
 0x65e   : > { %v802_v61 = vpop.f32.mrb[8].mxu1 }
 0x65f   : > { %v1485_v62 = vpop.f32.mrb[9].mxu1 }
 0x662   : > { %v880_v63 = vpop.f32.mrb[10].mxu1 }
 0x663   : > { %v884_v2 = vmul.f32 0.17677669, %v880_v63  ;;  %v1490_v3 = vpop.f32.mrb[11].mxu1 }
 0x665   : > { %v885_v4 = vsel %vm554_vm2, %v884_v2, -inf }
 0x666   : > { %886 = vmax.xlane.f32.xlu0 %v885_v4 }
 0x6f3   : > { %v887_v5 = vpop.xlane.xlu0 %886 }
 0x6f4   : > { %v888_v6 = vsub.f32 %v884_v2, %v887_v5 }
 0x6f6   : > { %v889_v7 = vmul.f32 1.442695, %v888_v6 }
 0x6f8   : > { %1706 = vpow2.f32 %v889_v7 }
 0x702   : > { %v1707_v8 = vpop.eup %1706 }
 0x703   : > { %v891_v9 = vsel %vm554_vm2, %v1707_v8, 0.0 }
 0x704   : > { %892 = vadd.xlane.f32.xlu1 %v891_v9 }
 0x715   : > { %972 = vrot.lane.b32.xlu1 %v2128_v23, %s1884_s12 }
 0x791   : > { %v893_v11 = vpop.xlane.xlu1 %892 }
 0x792   : > { %1708 = vrcp.f32 %v893_v11 }
 0x795   : > { %v973_v14 = vpop.permute.xlu1 %972 }
 0x79c   : > { %v1709_v12 = vpop.eup %1708 }
 0x79d   : > { %v895_v13 = vmul.f32 %v1709_v12, %v1707_v8 }
 0x79f   : > { %1494 = vmatmul.mubr.msk.f32.vlgmr.msra.gmra.mrb[12].mxu1 %vm554_vm2, %v895_v13 }
 0x7a0   : > { %1497 = vmatpush3.xpose.msk.msra.mxu1 %vm476_vm1, %v975_v10  ;;  %1498 = vmatprep.mubr.msk.f32.mxu1 %vm1881_vm0, %v1879_v0 }
 0x7a1   : > { %1501 = vmatprep.subr.mxu1 %v1879_v0 }
 0x7a3   : > { %1499 = vmatmul.mubr.msk.f32.vlgmr.msra.gmra.mrb[14].mxu1 %vm476_vm1, %v973_v14 }
 0x7a4   : > { %1503 = vmatprep.mubr.msk.f32.mxu1 %vm1881_vm0, %v1879_v0 }
 0x872   : > { %v968_v15 = vpop.f32.mrb[12].mxu1 }
 0x873   : > { %v1495_v16 = vpop.f32.mrb[13].mxu1 }
 0x876   : > { %v1046_v17 = vpop.f32.mrb[14].mxu1 }
 0x877   : > { %v1050_v18 = vmul.f32 0.17677669, %v1046_v17  ;;  %v1500_v19 = vpop.f32.mrb[15].mxu1 }
 0x879   : > { %v1051_v20 = vsel %vm554_vm2, %v1050_v18, -inf }
 0x87a   : > { %1052 = vmax.xlane.f32.xlu0 %v1051_v20 }
 0x890   : > { %1062 = vrot.lane.b32.xlu0 %v2137_v27, %s1884_s12  ;;  %v1155_v27 = vld [vmem:[#allocation7] sm:$0xff] }
 0x891   : > { %v1598_v32 = vpack.c.bf16 %v1156_v30, %v1155_v27 }
 0x893   : > { %1599 = vmatpush3.bf16.msra.mxu0 %v1598_v32 }
 0x894   : > { %1139 = vrot.lane.b32.xlu0 %v802_v61, %s1884_s12  ;;  %1600 = vmatprep.subr.bf16.mxu0 %v1880_v1 }
 0x897   : > { %1602 = vmatpush3.bf16.msra.mxu0 %v1601_v34 }
 0x898   : > { %1143 = vrot.lane.b32.xlu0 %v968_v15, %s1883_s28  ;;  %1603 = vmatprep.subr.bf16.mxu0 %v1880_v1 }
 0x89b   : > { %1605 = vmatpush3.bf16.msra.mxu0 %v1604_v37 }
 0x89c   : > { %1606 = vmatprep.subr.bf16.mxu0 %v1880_v1 }
 0x89f   : > { %1608 = vmatpush3.bf16.msra.mxu0 %v1607_v40 }
 0x8a0   : > { %1609 = vmatprep.subr.bf16.mxu0 %v1880_v1 }
 0x8a3   : > { %1611 = vmatpush3.bf16.msra.mxu0 %v1610_v44 }
 0x8a4   : > { %1612 = vmatprep.subr.bf16.mxu0 %v1880_v1 }
 0x8a7   : > { %1614 = vmatpush3.bf16.msra.mxu0 %v1613_v47 }
 0x8a8   : > { %1615 = vmatprep.subr.bf16.mxu0 %v1880_v1 }
 0x8ab   : > { %1617 = vmatpush3.bf16.msra.mxu0 %v1616_v50 }
 0x8ac   : > { %1618 = vmatprep.subr.bf16.mxu0 %v1880_v1  ;;  %v1376_v1 = vld [vmem:[%s2261_s4] ss:$0 sm:$0xff] }
 0x8af   : > { %1620 = vmatpush3.bf16.msra.mxu0 %v1619_v53 }
 0x907   : > { %v1053_v21 = vpop.xlane.xlu0 %1052 }
 0x908   : > { %v1054_v22 = vsub.f32 %v1050_v18, %v1053_v21 }
 0x90a   : > { %v1055_v23 = vmul.f32 1.442695, %v1054_v22 }
 0x90b   : > { %v1063_v24 = vpop.permute.xlu0 %1062 }
 0x90c   : > { %1710 = vpow2.f32 %v1055_v23  ;;  %1502 = vmatpush3.msra.mxu1 %v1063_v24 }
 0x90f   : > { %v1140_v56 = vpop.permute.xlu0 %1139 }
 0x910   : > { %v1150_v58 = vsel %vm476_vm1, %v2151_v43, %v1140_v56 }
 0x913   : > { %v1144_v57 = vpop.permute.xlu0 %1143 }
 0x914   : > { %v1152_v59 = vsel %vm1151_vm3, %v1150_v58, %v1144_v57 }
 0x916   : > { %v1711_v0 = vpop.eup %1710 }
 0x917   : > { %v1057_v25 = vsel %vm554_vm2, %v1711_v0, 0.0 }
 0x918   : > { %1058 = vadd.xlane.f32.xlu1 %v1057_v25 }
 0x9a5   : > { %v1059_v26 = vpop.xlane.xlu1 %1058 }
 0x9a6   : > { %1712 = vrcp.f32 %v1059_v26 }
 0x9b0   : > { %v1713_v28 = vpop.eup %1712 }
 0x9b1   : > { %v1061_v29 = vmul.f32 %v1713_v28, %v1711_v0 }
 0x9b3   : > { %1504 = vmatmul.mubr.msk.f32.vlgmr.msra.gmra.mrb[16].mxu1 %vm554_vm2, %v1061_v29 }
 0xa86   : > { %v1134_v54 = vpop.f32.mrb[16].mxu1 }
 0xa87   : > { %1147 = vrot.lane.b32.xlu0 %v1134_v54, %s1882_s10  ;;  %v1505_v55 = vpop.f32.mrb[17].mxu1 }
 0xaf9   : > { %v1148_v60 = vpop.permute.xlu0 %1147 }
 0xafa   : > { %v1154_v61 = vsel %vm1153_vm4, %v1152_v59, %v1148_v60 }
 0xafb   : > { %1539 = vmatmul.mubr.f32.vlgmr.msra.gmra.mrb[2].mxu0 %v1154_v61 }
 0xbce   : > { %v1244_v62 = vpop.f32.mrb[2].mxu0 }
 0xbcf   : > { %v1245_v63 = vadd.f32 %v1376_v1, %v1244_v62  ;;  %v1540_v2 = vpop.f32.mrb[3].mxu0 }
 0xbd1   : > { %1248 = vst [vmem:[%s268_s29] sm:$0xff] %v1245_v63 }
 0xbd2   : > { %1813 = shalt.err (!%p1810_p2)
}
 0xbd3   : > { %s1814_s14 = scalar_lea.hbm %s2213_s17, 128  ;;  %s1818_s12 = scalar_lea.hbm %s2262_s5, 256 }
 0xbd4   : > { %p1815_p13 = scmp.ne.s32.totalorder %s2213_s17, %s1814_s14  ;;  %p1819_p4 = scmp.lt.u32.totalorder %s2213_s17, %s2262_s5 }
 0xbd5   : > { %p1820_p7 = scmp.lt.u32.totalorder %s1818_s12, %s1814_s14  ;;  %p1822_p11 = scmp.lt.u32.totalorder %s1814_s14, %s2213_s17 }
 0xbd6   : > { %p1816_p6 = pnand %p1815_p13, %p2276_p0 }
 0xbd7   : > { %p1821_p8 = por %p1820_p7, %p1819_p4 }
 0xbd8   : > { %p1817_p10 = pneg %p1816_p6 }
 0xbd9   : > { %p1823_p1 = por %p1822_p11, %p1821_p8 }
 0xbdb   : > { %p1824_p3 = pnand %p1823_p1, %p1817_p10 }
 0xbdd   : > { %1827 = shalt.err (!%p1824_p3)
}
 0xbde   : > { %1631 = dma.vmem_to_hbm [thread:$0]  (%p2276_p0), %s2215_s8, 128, %s2213_s17, %s1250_s23  }
 0xbdf PF: > { %s1275_s6 = sand.u32 1, %s1858_s18   ;;  %p2277_p5 = scmp.ne.s32.totalorder %s2267_s25, 0 }
 0xbe0   : > { %p2278_p9 = scmp.ge.s32.totalorder %s1870_s21, 2  ;;  %s1276_s29 = scalar_lea.sflag [#allocation4], %s1275_s6 }
 0xbe2   : > { %p1645_p12 = pnand %p2278_p9, %p2277_p5 }
 0xbe4   : > { %1853 = dma.done.wait (!%p1645_p12), %s1276_s29, 128  }
 0xbe5   : > { %1855 = vsyncadd (!%p1645_p12), %s1276_s29, 4294967168  ;;  %p19_p2 = scmp.ge.s32.totalorder %s2026_s16, 4   ;;  %s2279_s18 = smov %s1862_s19 }
 0xbe6   : > { %s2280_s19 = smov %s1866_s20  ;;  %s2281_s20 = smov %s2035_s27 }
 0xbe7   : > { %s2282_s21 = smov %s2026_s16  ;;  %21 = sbr.rel (!%p19_p2) target bundleno = 6 (0x6), region = 93 }
 0xbee   :  { %1281 = vsyncpa [#allocation3], 1 }
 0xbef   :  { %1283 = vsyncpa [#allocation3 + $0x1], 1 }
 0xbf0   :  { %1284 = vsyncpa [#allocation6], 1 }
 0xbf1   :  { %1285 = vsyncpa [#allocation4], 1 }
 0xbf2   :  { %1287 = vsyncpa [#allocation4 + $0x1], 1 }

</bundles_post_ra>
